<compile_context>
chip_gen: v5e
topology: v5e:2x2
jax: 0.10.0
libtpu: 0.0.40
codegen_flags: <defaults>
</compile_context>

<pallas_src>
import jax
import jax.numpy as jnp
import numpy as np
from jax.experimental import pallas as pl
from jax.experimental.pallas import tpu as pltpu

MAX_LENGTH = 10  # parity with the reference module (S <= MAX_LENGTH)

# TODO(synk): nn.Dropout inside nn.GRU is training-only and a no-op for n_layers=1; not implemented.


def attn_decoder_kernel(
    slab_ref,    # VMEM (1, 9H)   [emb_row | last_context | h0 | b_ih | b_hh]
    enc_ref,     # VMEM (S, H)    encoder outputs
    encT_ref,    # VMEM (H, S)    encoder outputs, pre-transposed in the wrapper
    wih_ref,     # VMEM (2H, 3H)  GRU weight_ih.T (fused [emb|ctx] input)
    whh_ref,     # VMEM (H, 3H)   GRU weight_hh.T
    wattn_ref,   # VMEM (H, H)    Attn('general') weight, PyTorch layout (q = h @ W)
    wout_ref,    # VMEM (2H, TV)  streamed V-tile of out.weight.T
    bout_ref,    # VMEM (1, TV)   streamed V-tile of out.bias
    logits_ref,  # VMEM (1, TV)   OUT: raw logits tile (lane-dense)
    small_ref,   # VMEM (1, P)    OUT: [new_context | hidden | attn_weights | 0-pad]
    state_ref,   # VMEM (1, 2H)   scratch: [hidden | new_context], carried across V-tiles
):
    H = wattn_ref.shape[0]
    S = enc_ref.shape[0]

    # Heavy per-step state (GRU cell + attention) computed once, on the first V-tile.
    @pl.when(pl.program_id(0) == 0)
    def _compute_state():
        slab = slab_ref[...]
        rnn_in = slab[:, : 2 * H]              # cat(word_embedded, last_context)
        h0 = slab[:, 2 * H: 3 * H]
        b_ih = slab[:, 3 * H: 6 * H]
        b_hh = slab[:, 6 * H: 9 * H]

        # --- GRU cell (PyTorch gate order [r|z|n]; b_hh applied inside r*() for n) ---
        gi = jnp.dot(rnn_in, wih_ref[...], preferred_element_type=jnp.float32) + b_ih
        gh = jnp.dot(h0, whh_ref[...], preferred_element_type=jnp.float32) + b_hh
        r = jax.nn.sigmoid(gi[:, :H] + gh[:, :H])
        z = jax.nn.sigmoid(gi[:, H:2 * H] + gh[:, H:2 * H])
        n = jnp.tanh(gi[:, 2 * H:] + r * gh[:, 2 * H:])
        h_new = (1.0 - z) * n + z * h0                                   # (1, H)

        # --- Attn('general'): e_i = (h W_a) . enc_i  (bias dropped: softmax shift-invariant)
        q = jnp.dot(h_new, wattn_ref[...], preferred_element_type=jnp.float32)      # (1, H)
        energies = jnp.dot(q, encT_ref[...], preferred_element_type=jnp.float32)    # (1, S)
        m = jnp.max(energies, axis=1, keepdims=True)
        e = jnp.exp(energies - m)
        aw = e / jnp.sum(e, axis=1, keepdims=True)                       # (1, S)
        context = jnp.dot(aw, enc_ref[...], preferred_element_type=jnp.float32)     # (1, H)

        # carry [hidden | context] for the streamed output projection
        state_ref[...] = jnp.concatenate([h_new, context], axis=1)

        # lane-dense small output (padded to a multiple of 128 in the wrapper)
        P = small_ref.shape[1]
        parts = [context, h_new, aw]
        pad = P - (2 * H + S)
        if pad > 0:
            parts.append(jnp.zeros((1, pad), jnp.float32))
        small_ref[...] = jnp.concatenate(parts, axis=1)

    # --- streamed output projection: one raw-logits tile per grid step ---
    logits_ref[...] = (
        jnp.dot(state_ref[...], wout_ref[...], preferred_element_type=jnp.float32)
        + bout_ref[...])


def attn_decoder_forward(params, word_input, last_context, last_hidden,
                         encoder_outputs, *, tv=512):
    """word_input: (1,) int32, last_context: (1,H), last_hidden: (1,1,H),
       encoder_outputs: (S,1,H).  Returns (output, context, hidden, attn_weights)
       with the same shapes/semantics as the PyTorch module."""
    H = params["hidden_size"]
    V = params["output_size"]
    S = encoder_outputs.shape[0]

    tv = max(128, (tv // 128) * 128)                 # lane-dense V-tile
    v_pad = ((V + tv - 1) // tv) * tv
    nv = v_pad // tv
    p = ((2 * H + S + 127) // 128) * 128             # padded width of the small output

    w_out = params["w_out"]                          # (2H, V)
    b_out = params["b_out"]                          # (1, V)
    if v_pad != V:                                   # (at real sizes: pre-pad once in init)
        w_out = jnp.pad(w_out, ((0, 0), (0, v_pad - V)))
        b_out = jnp.pad(b_out, ((0, 0), (0, v_pad - V)))

    enc2d = encoder_outputs.reshape(S, H)
    encT = jnp.transpose(enc2d)                      # wrapper-side layout plumbing
    h0 = last_hidden.reshape(1, H)

    # One-row embedding gather (the full (V, H) table never enters VMEM), then pack all
    # tiny per-step operands into a single lane-dense slab -> one input DMA.
    idx = jnp.clip(word_input.astype(jnp.int32), 0, V - 1)
    emb_row = jnp.take(params["embedding"], idx, axis=0)            # (1, H)
    slab = jnp.concatenate(
        [emb_row, last_context, h0, params["b_ih"], params["b_hh"]], axis=1)  # (1, 9H)

    grid_spec = pltpu.PrefetchScalarGridSpec(
        num_scalar_prefetch=0,
        grid=(nv,),                                   # stream w_out over V-tiles
        in_specs=[
            pl.BlockSpec((1, 9 * H), lambda j: (0, 0)),       # packed small operands
            pl.BlockSpec((S, H), lambda j: (0, 0)),           # encoder outputs
            pl.BlockSpec((H, S), lambda j: (0, 0)),           # encoder outputs^T
            pl.BlockSpec((2 * H, 3 * H), lambda j: (0, 0)),   # w_ih (fused)
            pl.BlockSpec((H, 3 * H), lambda j: (0, 0)),       # w_hh
            pl.BlockSpec((H, H), lambda j: (0, 0)),           # w_attn
            pl.BlockSpec((2 * H, tv), lambda j: (0, j)),      # w_out V-tile (double-buffered)
            pl.BlockSpec((1, tv), lambda j: (0, j)),          # b_out V-tile
        ],
        out_specs=[
            pl.BlockSpec((1, tv), lambda j: (0, j)),          # raw logits tile
            pl.BlockSpec((1, p), lambda j: (0, 0)),           # [ctx | hid | aw] (resident)
        ],
        scratch_shapes=[pltpu.VMEM((1, 2 * H), jnp.float32)],
    )

    logits_pad, small = pl.pallas_call(
        attn_decoder_kernel,
        out_shape=(jax.ShapeDtypeStruct((1, v_pad), jnp.float32),
                   jax.ShapeDtypeStruct((1, p), jnp.float32)),
        grid_spec=grid_spec,
        compiler_params=pltpu.CompilerParams(
            dimension_semantics=("arbitrary",),       # scratch carry across V-tiles
            vmem_limit_bytes=32 * 1024 * 1024),
    )(slab, enc2d, encT,
      params["w_ih"], params["w_hh"], params["w_attn"], w_out, b_out)

    # finalize: (1, V) log_softmax in the wrapper (per review; tiny vs w_out streaming)
    logits = logits_pad[:, :V]
    logp = jax.nn.log_softmax(logits, axis=1)
    context = small[:, :H]
    hidden = small[:, H:2 * H].reshape(1, 1, H)
    attn_weights = small[:, 2 * H:2 * H + S].reshape(1, 1, S)
    return logp, context, hidden, attn_weights


def init_params(key, hidden_size, output_size):
    H, V = hidden_size, output_size
    ks = jax.random.split(key, 10)
    s = 1.0 / np.sqrt(H)

    def u(k, shape):
        return jax.random.uniform(k, shape, jnp.float32, -s, s)

    # PyTorch parameter shapes, stored pre-transposed/fused for the kernel.
    # (At real sizes store these in bf16 — fp8/int8 for w_out — to halve/quarter HBM traffic.)
    w_ih = u(ks[0], (3 * H, 2 * H))          # nn.GRU weight_ih_l0, gate order [r|z|n]
    w_hh = u(ks[1], (3 * H, H))              # nn.GRU weight_hh_l0
    w_attn = u(ks[2], (H, H))                # Attn('general') nn.Linear(H, H) weight
    w_out = u(ks[3], (V, 2 * H))             # self.out weight

    return {
        "hidden_size": H,
        "output_size": V,
        "embedding": jax.random.normal(ks[4], (V, H), jnp.float32),
        "w_ih": jnp.transpose(w_ih),         # (2H, 3H)
        "b_ih": u(ks[5], (1, 3 * H)),
        "w_hh": jnp.transpose(w_hh),         # (H, 3H)
        "b_hh": u(ks[6], (1, 3 * H)),
        "w_attn": w_attn,                    # (H, H) PyTorch layout; kernel uses q = h @ W
        "b_attn": u(ks[7], (1, H)),          # kept for the reference; a no-op for softmax
        "w_out": jnp.transpose(w_out),       # (2H, V)
        "b_out": u(ks[8], (1, V)),
    }


def reference_forward(params, word_input, last_context, last_hidden, encoder_outputs):
    """Pure-jnp reference mirroring the PyTorch forward (attention computed the PyTorch
    way — project every encoder output, WITH the bias — validating that the kernel's
    query-projection + bias-drop restructure is exactly equivalent)."""
    hp = jax.lax.Precision.HIGHEST
    H = params["hidden_size"]
    S = encoder_outputs.shape[0]
    enc = encoder_outputs.reshape(S, H)
    h0 = last_hidden.reshape(1, H)
    emb = params["embedding"][word_input[0]][None, :]
    rnn_in = jnp.concatenate([emb, last_context], axis=1)
    gi = jnp.dot(rnn_in, params["w_ih"], precision=hp) + params["b_ih"]
    gh = jnp.dot(h0, params["w_hh"], precision=hp) + params["b_hh"]
    r = jax.nn.sigmoid(gi[:, :H] + gh[:, :H])
    z = jax.nn.sigmoid(gi[:, H:2 * H] + gh[:, H:2 * H])
    n = jnp.tanh(gi[:, 2 * H:] + r * gh[:, 2 * H:])
    h_new = (1.0 - z) * n + z * h0
    proj = jnp.dot(enc, params["w_attn"].T, precision=hp) + params["b_attn"]   # nn.Linear(enc)
    energies = jnp.sum(proj * h_new, axis=1)                                   # (S,)
    aw = jax.nn.softmax(energies)
    context = jnp.dot(aw[None, :], enc, precision=hp)
    logits = (jnp.dot(jnp.concatenate([h_new, context], axis=1), params["w_out"],
                      precision=hp) + params["b_out"])
    logp = jax.nn.log_softmax(logits, axis=1)
    return logp, context, h_new.reshape(1, 1, H), aw.reshape(1, 1, S)


if __name__ == "__main__":
    H = 32        # hidden_size
    V = 300       # output_size (vocab); deliberately not a multiple of 128 to exercise padding
    S = 8         # encoder sequence length (<= MAX_LENGTH)

    key = jax.random.PRNGKey(0)
    k_param, k_ctx, k_hid, k_enc = jax.random.split(key, 4)
    params = init_params(k_param, H, V)

    word_input = jnp.array([7], dtype=jnp.int32)                        # (1,)
    last_context = jax.random.normal(k_ctx, (1, H), jnp.float32)        # (1, H)
    last_hidden = jax.random.normal(k_hid, (1, 1, H), jnp.float32)      # (n_layers, 1, H)
    encoder_outputs = jax.random.normal(k_enc, (S, 1, H), jnp.float32)  # (S, 1, H)

    # tv=128 -> V padded to 384, 3 grid steps: exercises the streamed w_out tiling.
    out = attn_decoder_forward(params, word_input, last_context, last_hidden,
                               encoder_outputs, tv=128)
    out = jax.block_until_ready(out)
    logp, context, hidden, attn_weights = out

    # sanity check against a pure-jnp reference of the PyTorch math
    ref = reference_forward(params, word_input, last_context, last_hidden, encoder_outputs)
    for a, b in zip(out, ref):
        np.testing.assert_allclose(np.asarray(a), np.asarray(b), atol=1e-3, rtol=1e-3)

    assert logp.shape == (1, V)
    assert context.shape == (1, H)
    assert hidden.shape == (1, 1, H)
    assert attn_weights.shape == (1, 1, S)

    print("KERNEL_OK")
</pallas_src>

<mosaic_0001>
module attributes {stable_mosaic.version = 11 : i64} {
  func.func @attn_decoder_kernel(%arg0: i32, %arg1: memref<1x288xf32, #tpu.memory_space<vmem>>, %arg2: memref<8x32xf32, #tpu.memory_space<vmem>>, %arg3: memref<32x8xf32, #tpu.memory_space<vmem>>, %arg4: memref<64x96xf32, #tpu.memory_space<vmem>>, %arg5: memref<32x96xf32, #tpu.memory_space<vmem>>, %arg6: memref<32x32xf32, #tpu.memory_space<vmem>>, %arg7: memref<64x128xf32, #tpu.memory_space<vmem>>, %arg8: memref<1x128xf32, #tpu.memory_space<vmem>>, %arg9: memref<1x128xf32, #tpu.memory_space<vmem>>, %arg10: memref<1x128xf32, #tpu.memory_space<vmem>>, %arg11: memref<1x64xf32, #tpu.memory_space<vmem>>) attributes {dimension_semantics = [#tpu.dimension_semantics<arbitrary>], iteration_bounds = array<i64: 3>, scalar_prefetch = 0 : i64, scratch_operands = 1 : i64, tpu.core_type = #tpu.core_type<tc>, window_params = [{pipeline_mode = #tpu.pipeline_mode<synchronous>, transform_indices = @transform_0, window_bounds = array<i64: 1, 288>}, {pipeline_mode = #tpu.pipeline_mode<synchronous>, transform_indices = @transform_1, window_bounds = array<i64: 8, 32>}, {pipeline_mode = #tpu.pipeline_mode<synchronous>, transform_indices = @transform_2, window_bounds = array<i64: 32, 8>}, {pipeline_mode = #tpu.pipeline_mode<synchronous>, transform_indices = @transform_3, window_bounds = array<i64: 64, 96>}, {pipeline_mode = #tpu.pipeline_mode<synchronous>, transform_indices = @transform_4, window_bounds = array<i64: 32, 96>}, {pipeline_mode = #tpu.pipeline_mode<synchronous>, transform_indices = @transform_5, window_bounds = array<i64: 32, 32>}, {transform_indices = @transform_6, window_bounds = array<i64: 64, 128>}, {transform_indices = @transform_7, window_bounds = array<i64: 1, 128>}, {transform_indices = @transform_8, window_bounds = array<i64: 1, 128>}, {pipeline_mode = #tpu.pipeline_mode<synchronous>, transform_indices = @transform_9, window_bounds = array<i64: 1, 128>}]} {
    %c0_i32 = arith.constant 0 : i32
    %0 = arith.cmpi eq, %arg0, %c0_i32 : i32
    %1 = arith.extui %0 : i1 to i32
    %c0_i32_0 = arith.constant 0 : i32
    %2 = arith.cmpi ne, %1, %c0_i32_0 : i32
    scf.if %2 {
      %c0_8 = arith.constant 0 : index
      %c0_9 = arith.constant 0 : index
      %9 = vector.load %arg1[%c0_8, %c0_9] : memref<1x288xf32, #tpu.memory_space<vmem>>, vector<1x288xf32>
      %10 = vector.extract_strided_slice %9 {offsets = [0, 0], sizes = [1, 64], strides = [1, 1]} : vector<1x288xf32> to vector<1x64xf32>
      %11 = vector.extract_strided_slice %9 {offsets = [0, 64], sizes = [1, 32], strides = [1, 1]} : vector<1x288xf32> to vector<1x32xf32>
      %12 = vector.extract_strided_slice %9 {offsets = [0, 96], sizes = [1, 96], strides = [1, 1]} : vector<1x288xf32> to vector<1x96xf32>
      %13 = vector.extract_strided_slice %9 {offsets = [0, 192], sizes = [1, 96], strides = [1, 1]} : vector<1x288xf32> to vector<1x96xf32>
      %c0_10 = arith.constant 0 : index
      %c0_11 = arith.constant 0 : index
      %14 = vector.load %arg4[%c0_10, %c0_11] : memref<64x96xf32, #tpu.memory_space<vmem>>, vector<64x96xf32>
      %cst_12 = arith.constant dense<0.000000e+00> : vector<1x96xf32>
      %15 = tpu.matmul %10, %14, %cst_12 {dimension_numbers = #tpu.dot_dimension_numbers<[1], [0], [0], [1], [0, 0, 1, 1], [], []>} : vector<1x64xf32>, vector<64x96xf32>, vector<1x96xf32> -> vector<1x96xf32>
      %16 = arith.addf %15, %12 : vector<1x96xf32>
      %c0_13 = arith.constant 0 : index
      %c0_14 = arith.constant 0 : index
      %17 = vector.load %arg5[%c0_13, %c0_14] : memref<32x96xf32, #tpu.memory_space<vmem>>, vector<32x96xf32>
      %cst_15 = arith.constant dense<0.000000e+00> : vector<1x96xf32>
      %18 = tpu.matmul %11, %17, %cst_15 {dimension_numbers = #tpu.dot_dimension_numbers<[1], [0], [0], [1], [0, 0, 1, 1], [], []>} : vector<1x32xf32>, vector<32x96xf32>, vector<1x96xf32> -> vector<1x96xf32>
      %19 = arith.addf %18, %13 : vector<1x96xf32>
      %20 = vector.extract_strided_slice %16 {offsets = [0, 0], sizes = [1, 32], strides = [1, 1]} : vector<1x96xf32> to vector<1x32xf32>
      %21 = vector.extract_strided_slice %19 {offsets = [0, 0], sizes = [1, 32], strides = [1, 1]} : vector<1x96xf32> to vector<1x32xf32>
      %22 = arith.addf %20, %21 : vector<1x32xf32>
      %23 = arith.negf %22 : vector<1x32xf32>
      %24 = math.exp %23 : vector<1x32xf32>
      %cst_16 = arith.constant 1.000000e+00 : f32
      %25 = vector.broadcast %cst_16 : f32 to vector<1x32xf32>
      %26 = arith.addf %25, %24 : vector<1x32xf32>
      %27 = arith.divf %25, %26 : vector<1x32xf32>
      %28 = vector.extract_strided_slice %16 {offsets = [0, 32], sizes = [1, 32], strides = [1, 1]} : vector<1x96xf32> to vector<1x32xf32>
      %29 = vector.extract_strided_slice %19 {offsets = [0, 32], sizes = [1, 32], strides = [1, 1]} : vector<1x96xf32> to vector<1x32xf32>
      %30 = arith.addf %28, %29 : vector<1x32xf32>
      %31 = arith.negf %30 : vector<1x32xf32>
      %32 = math.exp %31 : vector<1x32xf32>
      %cst_17 = arith.constant 1.000000e+00 : f32
      %33 = vector.broadcast %cst_17 : f32 to vector<1x32xf32>
      %34 = arith.addf %33, %32 : vector<1x32xf32>
      %35 = arith.divf %33, %34 : vector<1x32xf32>
      %36 = vector.extract_strided_slice %16 {offsets = [0, 64], sizes = [1, 32], strides = [1, 1]} : vector<1x96xf32> to vector<1x32xf32>
      %37 = vector.extract_strided_slice %19 {offsets = [0, 64], sizes = [1, 32], strides = [1, 1]} : vector<1x96xf32> to vector<1x32xf32>
      %38 = arith.mulf %27, %37 : vector<1x32xf32>
      %39 = arith.addf %36, %38 : vector<1x32xf32>
      %40 = math.tanh %39 : vector<1x32xf32>
      %cst_18 = arith.constant 1.000000e+00 : f32
      %41 = vector.broadcast %cst_18 : f32 to vector<1x32xf32>
      %42 = arith.subf %41, %35 : vector<1x32xf32>
      %43 = arith.mulf %42, %40 : vector<1x32xf32>
      %44 = arith.mulf %35, %11 : vector<1x32xf32>
      %45 = arith.addf %43, %44 : vector<1x32xf32>
      %c0_19 = arith.constant 0 : index
      %c0_20 = arith.constant 0 : index
      %46 = vector.load %arg6[%c0_19, %c0_20] : memref<32x32xf32, #tpu.memory_space<vmem>>, vector<32x32xf32>
      %cst_21 = arith.constant dense<0.000000e+00> : vector<1x32xf32>
      %47 = tpu.matmul %45, %46, %cst_21 {dimension_numbers = #tpu.dot_dimension_numbers<[1], [0], [0], [1], [0, 0, 1, 1], [], []>} : vector<1x32xf32>, vector<32x32xf32>, vector<1x32xf32> -> vector<1x32xf32>
      %c0_22 = arith.constant 0 : index
      %c0_23 = arith.constant 0 : index
      %48 = vector.load %arg3[%c0_22, %c0_23] : memref<32x8xf32, #tpu.memory_space<vmem>>, vector<32x8xf32>
      %cst_24 = arith.constant dense<0.000000e+00> : vector<1x8xf32>
      %49 = tpu.matmul %47, %48, %cst_24 {dimension_numbers = #tpu.dot_dimension_numbers<[1], [0], [0], [1], [0, 0, 1, 1], [], []>} : vector<1x32xf32>, vector<32x8xf32>, vector<1x8xf32> -> vector<1x8xf32>
      %cst_25 = arith.constant dense<0xFF800000> : vector<1xf32>
      %50 = vector.multi_reduction <maximumf>, %49, %cst_25 [1] : vector<1x8xf32> to vector<1xf32>
      %51 = vector.shape_cast %50 : vector<1xf32> to vector<1x1xf32>
      %52 = vector.broadcast %51 : vector<1x1xf32> to vector<1x8xf32>
      %53 = arith.subf %49, %52 : vector<1x8xf32>
      %54 = math.exp %53 : vector<1x8xf32>
      %cst_26 = arith.constant dense<0.000000e+00> : vector<1xf32>
      %55 = vector.multi_reduction <add>, %54, %cst_26 [1] : vector<1x8xf32> to vector<1xf32>
      %56 = vector.shape_cast %55 : vector<1xf32> to vector<1x1xf32>
      %57 = vector.broadcast %56 : vector<1x1xf32> to vector<1x8xf32>
      %58 = arith.divf %54, %57 : vector<1x8xf32>
      %c0_27 = arith.constant 0 : index
      %c0_28 = arith.constant 0 : index
      %59 = vector.load %arg2[%c0_27, %c0_28] : memref<8x32xf32, #tpu.memory_space<vmem>>, vector<8x32xf32>
      %cst_29 = arith.constant dense<0.000000e+00> : vector<1x32xf32>
      %60 = tpu.matmul %58, %59, %cst_29 {dimension_numbers = #tpu.dot_dimension_numbers<[1], [0], [0], [1], [0, 0, 1, 1], [], []>} : vector<1x8xf32>, vector<8x32xf32>, vector<1x32xf32> -> vector<1x32xf32>
      %61 = tpu.concatenate %45, %60 in 1 : vector<1x32xf32>, vector<1x32xf32> -> vector<1x64xf32>
      %c0_30 = arith.constant 0 : index
      %c0_31 = arith.constant 0 : index
      %62 = vector.load %arg11[%c0_30, %c0_31] : memref<1x64xf32, #tpu.memory_space<vmem>>, vector<1x64xf32>
      tpu.vector_store %arg11[%c0_30, %c0_31], %61 {strides = array<i32>} : memref<1x64xf32, #tpu.memory_space<vmem>>, vector<1x64xf32>,
      %cst_32 = arith.constant 0.000000e+00 : f32
      %63 = vector.broadcast %cst_32 : f32 to vector<1x56xf32>
      %64 = tpu.concatenate %60, %45, %58, %63 in 1 : vector<1x32xf32>, vector<1x32xf32>, vector<1x8xf32>, vector<1x56xf32> -> vector<1x128xf32>
      %c0_33 = arith.constant 0 : index
      %c0_34 = arith.constant 0 : index
      %65 = vector.load %arg10[%c0_33, %c0_34] : memref<1x128xf32, #tpu.memory_space<vmem>>, vector<1x128xf32>
      tpu.vector_store %arg10[%c0_33, %c0_34], %64 {strides = array<i32>} : memref<1x128xf32, #tpu.memory_space<vmem>>, vector<1x128xf32>,
    } else {
    }
    %c0 = arith.constant 0 : index
    %c0_1 = arith.constant 0 : index
    %3 = vector.load %arg11[%c0, %c0_1] : memref<1x64xf32, #tpu.memory_space<vmem>>, vector<1x64xf32>
    %c0_2 = arith.constant 0 : index
    %c0_3 = arith.constant 0 : index
    %4 = vector.load %arg7[%c0_2, %c0_3] : memref<64x128xf32, #tpu.memory_space<vmem>>, vector<64x128xf32>
    %cst = arith.constant dense<0.000000e+00> : vector<1x128xf32>
    %5 = tpu.matmul %3, %4, %cst {dimension_numbers = #tpu.dot_dimension_numbers<[1], [0], [0], [1], [0, 0, 1, 1], [], []>} : vector<1x64xf32>, vector<64x128xf32>, vector<1x128xf32> -> vector<1x128xf32>
    %c0_4 = arith.constant 0 : index
    %c0_5 = arith.constant 0 : index
    %6 = vector.load %arg8[%c0_4, %c0_5] : memref<1x128xf32, #tpu.memory_space<vmem>>, vector<1x128xf32>
    %7 = arith.addf %5, %6 : vector<1x128xf32>
    %c0_6 = arith.constant 0 : index
    %c0_7 = arith.constant 0 : index
    %8 = vector.load %arg9[%c0_6, %c0_7] : memref<1x128xf32, #tpu.memory_space<vmem>>, vector<1x128xf32>
    tpu.vector_store %arg9[%c0_6, %c0_7], %7 {strides = array<i32>} : memref<1x128xf32, #tpu.memory_space<vmem>>, vector<1x128xf32>,
    return
  }
  func.func @transform_0(%arg0: i32) -> (i32, i32) {
    %c0_i32 = arith.constant 0 : i32
    %c0_i32_0 = arith.constant 0 : i32
    %c0_i32_1 = arith.constant 0 : i32
    return %c0_i32, %c0_i32_0 : i32, i32
  }
  func.func @transform_1(%arg0: i32) -> (i32, i32) {
    %c0_i32 = arith.constant 0 : i32
    %c0_i32_0 = arith.constant 0 : i32
    %c0_i32_1 = arith.constant 0 : i32
    return %c0_i32, %c0_i32_0 : i32, i32
  }
  func.func @transform_2(%arg0: i32) -> (i32, i32) {
    %c0_i32 = arith.constant 0 : i32
    %c0_i32_0 = arith.constant 0 : i32
    %c0_i32_1 = arith.constant 0 : i32
    return %c0_i32, %c0_i32_0 : i32, i32
  }
  func.func @transform_3(%arg0: i32) -> (i32, i32) {
    %c0_i32 = arith.constant 0 : i32
    %c0_i32_0 = arith.constant 0 : i32
    %c0_i32_1 = arith.constant 0 : i32
    return %c0_i32, %c0_i32_0 : i32, i32
  }
  func.func @transform_4(%arg0: i32) -> (i32, i32) {
    %c0_i32 = arith.constant 0 : i32
    %c0_i32_0 = arith.constant 0 : i32
    %c0_i32_1 = arith.constant 0 : i32
    return %c0_i32, %c0_i32_0 : i32, i32
  }
  func.func @transform_5(%arg0: i32) -> (i32, i32) {
    %c0_i32 = arith.constant 0 : i32
    %c0_i32_0 = arith.constant 0 : i32
    %c0_i32_1 = arith.constant 0 : i32
    return %c0_i32, %c0_i32_0 : i32, i32
  }
  func.func @transform_6(%arg0: i32) -> (i32, i32) {
    %c0_i32 = arith.constant 0 : i32
    %c0_i32_0 = arith.constant 0 : i32
    return %c0_i32, %arg0 : i32, i32
  }
  func.func @transform_7(%arg0: i32) -> (i32, i32) {
    %c0_i32 = arith.constant 0 : i32
    %c0_i32_0 = arith.constant 0 : i32
    return %c0_i32, %arg0 : i32, i32
  }
  func.func @transform_8(%arg0: i32) -> (i32, i32) {
    %c0_i32 = arith.constant 0 : i32
    %c0_i32_0 = arith.constant 0 : i32
    return %c0_i32, %arg0 : i32, i32
  }
  func.func @transform_9(%arg0: i32) -> (i32, i32) {
    %c0_i32 = arith.constant 0 : i32
    %c0_i32_0 = arith.constant 0 : i32
    %c0_i32_1 = arith.constant 0 : i32
    return %c0_i32, %c0_i32_0 : i32, i32
  }
}

</mosaic_0001>

<bundles_post_ra>
// kernel: tpu_custom_call.1
= control target key start
LH: loop header
LB: loop body
LE: loop exit
PB: predicated region body
PF: predicated region fallthrough
CT: control target
= control target key end

     0   :  { %s1425_s0 = inlined_call_operand.vmem [shape: f32[1,288], index: 0, kind: input, shape index: {}]   ;;  %s1426_s1 = inlined_call_operand.vmem [shape: f32[8,32], index: 1, kind: input, shape index: {}]   ;;  %s1427_s2 = inlined_call_operand.vmem [shape: f32[32,8], index: 2, kind: input, shape index: {}]   ;;  %s1428_s3 = inlined_call_operand.hbm [shape: f32[64,96], index: 3, kind: input, shape index: {}]   ;;  %s1429_s4 = inlined_call_operand.vmem [shape: f32[32,96], index: 4, kind: input, shape index: {}]   ;;  %s1430_s5 = inlined_call_operand.hbm [shape: f32[32,32], index: 5, kind: input, shape index: {}]   ;;  %s1431_s6 = inlined_call_operand.hbm [shape: f32[64,384], index: 6, kind: input, shape index: {}]   ;;  %s1432_s7 = inlined_call_operand.vmem [shape: f32[1,384], index: 7, kind: input, shape index: {}]   ;;  %s1433_s8 = inlined_call_operand.hbm [shape: f32[1,384], index: 8, kind: output, shape index: {0}]   ;;  %s1434_s9 = inlined_call_operand.hbm [shape: f32[1,128], index: 9, kind: output, shape index: {1}]  }
   0x1   :  { %1443 = sst [smem:[#allocation22_spill]] %s1428_s3 }
   0x2   :  { %1444 = sst [smem:[#allocation23_spill]] %s1430_s5 }
   0x3   :  { %1445 = sst [smem:[#allocation24_spill]] %s1433_s8 }
   0x4   :  { %15 = vsyncpa [#allocation4], 0 }
   0x5   :  { %16 = vsyncpa [#allocation7], 0 }
   0x6   :  { %17 = vsyncpa [#allocation5], 0 }
   0x7   :  { %19 = vsyncpa [#allocation5 + $0x1], 0 }
   0x8   :  { %20 = vsyncpa [#allocation11], 0  ;;  %s1176_s30 = smov 0   ;;  %s1178_s10 = smov 0  }
   0x9   :  { %s1180_s11 = smov 0   ;;  %s1182_s12 = smov 0  }
   0xa LB: > { %1446 = sst [smem:[#allocation17_spill]] %s1103_s30  ;;  %s1197_s13 = sadd.s32 4294967295, %s1115_s12   ;;  %s1115_s12 = sphi %s1182_s12, %s1467_s12   ;;  %s1111_s11 = sphi %s1180_s11, %s1471_s11   ;;  %s1107_s10 = sphi %s1178_s10, %s1470_s10   ;;  %s1103_s30 = sphi %s1176_s30, %s1469_s30  }
   0xb   : > { %s806_s14 = sadd.s32 4294967294, %s1115_s12   ;;  %s1201_s15 = sadd.s32 1, %s1115_s12  }
   0xc   : > { %1447 = sst [smem:[#allocation18_spill]] %s1201_s15  ;;  %s159_s16 = sadd.s32 1, %s1111_s11 }
   0xd   : > { %s156_s17 = ssub.s32 %s1115_s12, %s1201_s15  ;;  %p166_p0 = scmp.ne.s32.totalorder %s1111_s11, %s1107_s10 }
   0xe   : > { %p157_p1 = scmp.eq.s32.totalorder %s156_s17, 0  ;;  %p167_p2 = scmp.eq.s32.totalorder %s1115_s12, 0 }
   0xf   : > { %p172_p3 = scmp.ne.s32.totalorder %s1107_s10, %s1103_s30  ;;  %p173_p4 = scmp.eq.s32.totalorder %s1197_s13, 0 }
  0x10   : > { %s1213_s18 = scalar_select %p157_p1, %s1111_s11, %s159_s16  }
  0x11   : > { %p1215_p5 = por %p167_p2, %p166_p0  ;;  %p1221_p6 = por %p173_p4, %p172_p3 }
  0x12   : > { %1448 = sst [smem:[#allocation19_spill]] %s1213_s18  ;;  %p1442_p7 = scmp.eq.s32.totalorder %s1197_s13, 2 }
  0x13   : > { %p228_p8 = scmp.eq.s32.totalorder %s806_s14, 2  ;;  %p807_p9 = scmp.ge.s32.totalorder %s1115_s12, 1 }
  0x14   : > { %p256_p10 = scmp.lt.s32.totalorder %s1115_s12, 4  ;;  %p1230_p11 = por %p1442_p7, %p166_p0 }
  0x15   : > { %p1234_p12 = por %p228_p8, %p172_p3  ;;  %s1456_s3 = sld [smem:[#allocation22_spill]] }
  0x16   : > { %s1451_s21 = scalar_select %p1230_p11, 1, 0 }
  0x17   : > { %s1453_s22 = scalar_select %p1234_p12, 1, 0 }
  0x18   : > { %1452 = sst [smem:[#allocation20_spill]] %s1451_s21  ;;  %p1238_p13 = pnand %p807_p9, %p256_p10 }
  0x19   : > { %1454 = sst [smem:[#allocation21_spill]] %s1453_s22  ;;  %s1117_s27 = smov [#allocation3]  }
  0x1a   : > { %p845_p2 = pneg %p1238_p13  ;;  %s278_s28 = sshll.u32 %s1117_s27, 4  ;;  %s279_s28 = int_to_ptr.vmem [resolvable:$true] %s278_s28 }
  0x1b   : > { %s276_s26 = sshll.u32 %s1456_s3, 4  ;;  %p862_p3 = scmp.lt.s32.totalorder %s1115_s12, 3  ;;  %s277_s26 = int_to_ptr.hbm [resolvable:$true] %s276_s26 }
  0x1c   : > { %p846_p0 = pnand %p845_p2, %p173_p4  ;;  %s1118_s29 = smov 128  }
  0x1d   : > { %s1119_s14 = smov 8   ;;  %p1256_p8 = pnand %p862_p3, %p1215_p5 }
  0x1e   : > { %848 = dma.hbm_to_vmem [thread:$0]  (!%p846_p0), %s277_s26, 1024, %s279_s28, [#allocation4], %s1118_s29, %s1118_s29, %s1119_s14  }
  0x1f   : > { %s1458_s5 = sld [smem:[#allocation23_spill]]  ;;  %s1120_s27 = smov [#allocation6]  }
  0x20   : > { %s295_s3 = sshll.u32 %s1120_s27, 4  ;;  %s309_s18 = sand.u32 1, %s1115_s12   ;;  %s296_s3 = int_to_ptr.vmem [resolvable:$true] %s295_s3 }
  0x21   : > { %s311_s26 = sand.u32 1, %s1111_s11   ;;  %s812_s28 = sshll.u32 %s1115_s12, 3 }
  0x22   : > { %s811_s19 = sshll.u32 %s311_s26, 6  ;;  %s317_s30 = scalar_lea.hbm %s1431_s6, %s812_s28 }
  0x23   : > { %s318_s8 = sshll.u32 %s317_s30, 4  ;;  %s313_s17 = scalar_lea.vmem [#allocation8], %s811_s19  ;;  %s319_s8 = int_to_ptr.hbm [resolvable:$true] %s318_s8 }
  0x24   : > { %s320_s24 = sshll.u32 %s313_s17, 4  ;;  %s310_s27 = scalar_lea.sflag [#allocation4], %s309_s18  ;;  %s321_s24 = int_to_ptr.vmem [resolvable:$true] %s320_s24 }
  0x25   : > { %s293_s25 = sshll.u32 %s1458_s5, 4  ;;  %s979_s5 = sshra.s32 %s319_s8, 4  ;;  %s294_s25 = int_to_ptr.hbm [resolvable:$true] %s293_s25  ;;  %s980_s5 = int_to_ptr.hbm [resolvable:$true] %s979_s5 }
  0x26   : > { %851 = dma.hbm_to_vmem [thread:$0]  (!%p846_p0), %s294_s25, 512, %s296_s3, [#allocation7], %s1118_s29, %s1118_s29, %s1119_s14  }
  0x27   : > { %s981_s21 = scalar_lea.hbm %s980_s5, 64  ;;  %p983_p9 = pneg %p1256_p8 }
  0x28   : > { %p982_p5 = scmp.ne.s32.totalorder %s980_s5, %s981_s21  ;;  %s986_s26 = scalar_lea.hbm %s1431_s6, 192 }
  0x29   : > { %p987_p0 = scmp.lt.s32.totalorder %s980_s5, %s1431_s6  ;;  %p988_p3 = scmp.lt.s32.totalorder %s986_s26, %s981_s21 }
  0x2a   : > { %p984_p10 = pnand %p983_p9, %p982_p5 }
  0x2b   : > { %p989_p7 = por %p988_p3, %p987_p0 }
  0x2c   : > { %p985_p2 = pneg %p984_p10 }
  0x2e   : > { %p990_p1 = pnand %p989_p7, %p985_p2 }
  0x30   : > { %993 = shalt.err (!%p990_p1)
}
  0x31   : > { %s1121_s30 = smov 384   ;;  %338 = sbr.rel (%p1238_p13) target bundleno = 1689 (0x699), region = 52 }
  0x32   : > { %855 = dma.hbm_to_vmem [thread:$0]  (!%p1256_p8), %s319_s8, 1024, %s321_s24, %s310_s27, %s1121_s30, %s1118_s29, %s1119_s14  }
  0x36   : > { %1082 = dma.done.wait (%p173_p4), [#allocation4], 1024  }
  0x37   : > { %1084 = vsyncadd (%p173_p4), [#allocation4], 4294966272 }
  0x38   : > { %1086 = dma.done.wait (%p173_p4), [#allocation7], 512  }
  0x39   : > { %1088 = vsyncadd (%p173_p4), [#allocation7], 4294966784  ;;  %s350_s5 = sand.u32 1, %s1197_s13   ;;  %s1296_s8 = sand.u32 1, %s1107_s10  }
  0x3a   : > { %s816_s18 = sshll.u32 %s1296_s8, 6  ;;  %s351_s21 = scalar_lea.sflag [#allocation4], %s350_s5 }
  0x3b   : > { %s1299_s23 = scalar_lea.vmem [#allocation8], %s816_s18 }
  0x3c   : > { %1090 = dma.done.wait (%p1221_p6), %s351_s21, 1024  }
  0x3d   : > { %1092 = vsyncadd (%p1221_p6), %s351_s21, 4294966272  ;;  %p392_p4 = scmp.lt.s32.totalorder %s1197_s13, 2  ;;  %s389_s28 = scalar_lea.vmem [#allocation9], %s1296_s8 }
  0x3e   : > { %p1459_p7 = scmp.ne.s32.totalorder %s1197_s13, 0 }
  0x3f   : > { %s1307_s29 = scalar_select %p392_p4, %s1197_s13, 2 }
  0x40   : > { %398 = sbr.rel (%p1459_p7) target bundleno = 1537 (0x601), region = 68  ;;  %s1122_s3 = smov (!%p1459_p7), 64  }
  0x41   : > { %s394_s19 = scalar_lea.vmem %s1432_s7, %s1307_s29  ;;  %s1123_s18 = smov (!%p1459_p7), 32  }
  0x42   : > { %s1124_s21 = smov (!%p1459_p7), 96  }
  0x45   : > { %v399_v0 = vld [vmem:[%s1425_s0] sm:$0x7]  ;;  %v406_v2 = vld [vmem:[#allocation3 + $0x30] sm:$0xff]  ;;  %v405_v4 = vld [vmem:[#allocation3 + $0x28] sm:$0xff]  ;;  %vm418_vm0 = vcmask 523264   ;;  %vm415_vm1 = vcmask 261120  }
  0x46   : > { %v407_v1 = vld [vmem:[#allocation3 + $0x38] sm:$0xff]  ;;  %v409_v3 = vperm.slane %v399_v0, 0  ;;  %v443_v6 = vld [vmem:[%s1429_s4 + $0x10] sm:$0xff]  ;;  %v404_v7 = vld [vmem:[#allocation3 + $0x20] sm:$0xff]  ;;  %v447_v14 = vperm.slane %v399_v0, 2  ;;  %v410_v15 = vperm.slane %v399_v0, 1 }
  0x47   : > { %429 = vmatpush.msra.mxu0 %v407_v1  ;;  %v444_v5 = vld [vmem:[%s1429_s4 + $0x18] sm:$0xff]  ;;  %v442_v8 = vld [vmem:[%s1429_s4 + $0x8] sm:$0xff]  ;;  %v441_v10 = vld [vmem:[%s1429_s4] sm:$0xff]  ;;  %vm574_vm6 = vcmask 57344   ;;  %vm600_vm11 = vcmask 64512   ;;  %vm637_vm12 = vcmask 588800  }
  0x48   : > { %445 = vrot.lane.b32.xlu0 %v409_v3, %s1122_s3  ;;  %468 = vmatpush.msra.mxu1 %v444_v5  ;;  %v403_v9 = vld [vmem:[#allocation3 + $0x18] sm:$0xff]  ;;  %v402_v11 = vld [vmem:[#allocation3 + $0x10] sm:$0xff]  ;;  %v401_v12 = vld [vmem:[#allocation3 + $0x8] sm:$0xff]  ;;  %vm630_vm13 = vcmask 516096  }
  0x49   : > { %430 = vmatpush.msra.mxu0 %v406_v2  ;;  %v400_v13 = vld [vmem:[#allocation3] sm:$0xff]  ;;  %450 = vrot.lane.b32.xlu1 %v447_v14, %s1122_s3  ;;  %v521_v46 = vld [vmem:[#allocation6 + $0x18] sm:$0xff]  ;;  %v520_v47 = vld [vmem:[#allocation6 + $0x10] sm:$0xff] }
  0x4a   : > { %469 = vmatpush.msra.mxu1 %v443_v6  ;;  %413 = vrot.lane.b32.xlu2 %v410_v15, %s1123_s18  ;;  %v519_v48 = vld [vmem:[#allocation6 + $0x8] sm:$0xff]  ;;  %v518_v49 = vld [vmem:[#allocation6] sm:$0xff]  ;;  %v550_v56 = vld [vmem:[%s1427_s2 + $0x18] sm:$0xff] }
  0x4b   : > { %431 = vmatpush.msra.mxu0 %v405_v4  ;;  %539 = vmatpush.msra.mxu2 %v521_v46  ;;  %v549_v57 = vld [vmem:[%s1427_s2 + $0x10] sm:$0xff]  ;;  %v548_v58 = vld [vmem:[%s1427_s2 + $0x8] sm:$0xff]  ;;  %v547_v60 = vld [vmem:[%s1427_s2] sm:$0xff] }
  0x4c   : > { %470 = vmatpush.msra.mxu1 %v442_v8  ;;  %566 = vmatpush.msra.mxu3 %v550_v56  ;;  %v599_v5 = vld [vmem:[%s1426_s1] sm:$0xff] }
  0x4d   : > { %432 = vmatpush.msra.mxu0 %v404_v7  ;;  %540 = vmatpush.msra.mxu2 %v520_v47 }
  0x4e   : > { %471 = vmatpush.msra.mxu1 %v441_v10  ;;  %567 = vmatpush.msra.mxu3 %v549_v57 }
  0x4f   : > { %433 = vmatpush.msra.mxu0 %v403_v9  ;;  %541 = vmatpush.msra.mxu2 %v519_v48 }
  0x50   : > { %448 = vrot.lane.b32.xlu0 %v410_v15, %s1122_s3  ;;  %568 = vmatpush.msra.mxu3 %v548_v58 }
  0x51   : > { %434 = vmatpush.msra.mxu0 %v402_v11  ;;  %411 = vrot.lane.b32.xlu1 %v409_v3, %s1123_s18 }
  0x52   : > { %542 = vmatpush.msra.mxu2 %v518_v49  ;;  %569 = vmatpush.msra.mxu3 %v547_v60 }
  0x53   : > { %435 = vmatpush.msra.mxu0 %v401_v12  ;;  %619 = vmatpush.msrb.mxu1 %v599_v5 }
  0x55   : > { %436 = vmatpush.msra.mxu0 %v400_v13 }
  0x56   : > { %818 = vmatmul.msk.f32.vlgmr.msra.gmra.mxu0 %vm418_vm0, %v399_v0 }
  0xa4   : > { %v414_v22 = vpop.permute.xlu2 %413 }
  0xba   : > { %v446_v16 = vpop.permute.xlu0 %445 }
  0xbb   : > { %819 = vmatmul.msk.f32.vlgmr.msra.gmra.mxu1 %vm415_vm1, %v446_v16  ;;  %v451_v18 = vpop.permute.xlu1 %450 }
  0xc2   : > { %v449_v17 = vpop.permute.xlu0 %448 }
  0xc3   : > { %v452_v19 = vsel %vm418_vm0, %v449_v17, %v451_v18  ;;  %v412_v23 = vpop.permute.xlu1 %411 }
  0xc4   : > { %v416_v24 = vsel %vm415_vm1, %v412_v23, %v414_v22 }
  0xd3   : > { %v438_v25 = vpop.f32.mrf.mxu0 }
  0xd4   : > { %v439_v26 = vadd.f32 %v438_v25, %v416_v24 }
 0x138   : > { %v473_v20 = vpop.f32.mrf.mxu1 }
 0x139   : > { %v474_v21 = vadd.f32 %v473_v20, %v452_v19 }
 0x13b   : > { %497 = vrot.lane.b32.xlu2 %v474_v21, %s1122_s3  ;;  %v476_v27 = vadd.f32 %v474_v21, %v439_v26 }
 0x13d   : > { %v820_v28 = vmul.f32 -1.442695, %v476_v27 }
 0x13f   : > { %909 = vpow2.f32 %v820_v28 }
 0x143   : > { %513 = vrot.lane.b32.xlu2 %v409_v3, %s1124_s21 }
 0x145   : > { %v910_v29 = vpop.eup %909 }
 0x146   : > { %v480_v30 = vadd.f32 1.0, %v910_v29 }
 0x148   : > { %911 = vrcp.f32 %v480_v30  ;;  %v492_v36 = vand.u32 2147483648, %v480_v30  ;;  %vm486_vm3 = vweird.f32 %v480_v30  ;;  %v490_v37 = vand.u32 2147483647, %v480_v30 }
 0x14a   : > { %v493_v39 = vor.u32 1.1754944e-38, %v492_v36  ;;  %vm491_vm5 = vcmp.eq.f32.partialorder %v490_v37, 8.507059e+37 }
 0x14e   : > { %v912_v31 = vpop.eup %911 }
 0x14f   : > { %v482_v32 = vmul.f32 %v912_v31, %v480_v30  ;;  %vm487_vm2 = vweird.f32 %v912_v31 }
 0x150   : > { %vm488_vm4 = vmor %vm486_vm3, %vm487_vm2 }
 0x151   : > { %v483_v33 = vsub.f32 1.0, %v482_v32 }
 0x153   : > { %v484_v34 = vmul.f32 %v912_v31, %v483_v33 }
 0x155   : > { %v485_v35 = vadd.f32 %v912_v31, %v484_v34 }
 0x157   : > { %v489_v38 = vsel %vm488_vm4, %v912_v31, %v485_v35 }
 0x158   : > { %v494_v41 = vsel %vm491_vm5, %v493_v39, %v489_v38 }
 0x159   : > { %v507_v51 = vsub.f32 1.0, %v494_v41 }
 0x195   : > { %v498_v40 = vpop.permute.xlu2 %497 }
 0x196   : > { %v500_v42 = vmul.f32 %v498_v40, %v494_v41 }
 0x198   : > { %502 = vrot.lane.b32.xlu0 %v500_v42, %s1122_s3 }
 0x19d   : > { %v514_v50 = vpop.permute.xlu2 %513 }
 0x19e   : > { %v516_v53 = vmul.f32 %v514_v50, %v494_v41 }
 0x20a   : > { %v503_v43 = vpop.permute.xlu0 %502 }
 0x20b   : > { %v505_v44 = vadd.f32 %v503_v43, %v439_v26 }
 0x20d   : > { %913 = vtanh.f32 %v505_v44 }
 0x213   : > { %v914_v45 = vpop.eup %913 }
 0x214   : > { %509 = vrot.lane.b32.xlu1 %v914_v45, %s1124_s21 }
 0x286   : > { %v510_v52 = vpop.permute.xlu1 %509 }
 0x287   : > { %v512_v54 = vmul.f32 %v510_v52, %v507_v51 }
 0x289   : > { %v517_v55 = vadd.f32 %v516_v53, %v512_v54 }
 0x28b   : > { %523 = vrot.lane.b32.xlu0 %v517_v55, %s1124_s21 }
 0x2fd   : > { %v524_v59 = vpop.permute.xlu0 %523 }
 0x2fe   : > { %821 = vmatmul.msk.f32.vlgmr.msra.gmra.mxu2 %vm415_vm1, %v524_v59 }
 0x381   : > { %v544_v61 = vpop.f32.mrf.mxu2 }
 0x382   : > { %822 = vmatmul.msk.f32.vlgmr.msra.gmra.mxu3 %vm415_vm1, %v544_v61 }
 0x405   : > { %v571_v62 = vpop.f32.mrf.mxu3 }
 0x406   : > { %v575_v63 = vsel %vm574_vm6, %v571_v62, -inf }
 0x407   : > { %576 = vmax.xlane.f32.xlu1 %v575_v63 }
 0x47a   : > { %v577_v0 = vpop.xlane.xlu1 %576 }
 0x47b   : > { %v578_v1 = vsub.f32 %v571_v62, %v577_v0 }
 0x47d   : > { %v579_v2 = vmul.f32 1.442695, %v578_v1 }
 0x47f   : > { %915 = vpow2.f32 %v579_v2 }
 0x485   : > { %v916_v3 = vpop.eup %915 }
 0x486   : > { %v581_v4 = vsel %vm574_vm6, %v916_v3, 0.0 }
 0x487   : > { %582 = vadd.xlane.f32.xlu2 %v581_v4 }
 0x4fa   : > { %v583_v6 = vpop.xlane.xlu2 %582 }
 0x4fb   : > { %917 = vrcp.f32 %v583_v6  ;;  %v595_v10 = vand.u32 2147483648, %v583_v6  ;;  %v593_v12 = vand.u32 2147483647, %v583_v6  ;;  %vm589_vm8 = vweird.f32 %v583_v6 }
 0x4fd   : > { %v596_v14 = vor.u32 1.1754944e-38, %v595_v10  ;;  %vm594_vm10 = vcmp.eq.f32.partialorder %v593_v12, 8.507059e+37 }
 0x501   : > { %v918_v7 = vpop.eup %917 }
 0x502   : > { %v585_v8 = vmul.f32 %v918_v7, %v583_v6  ;;  %vm590_vm7 = vweird.f32 %v918_v7 }
 0x503   : > { %vm591_vm9 = vmor %vm589_vm8, %vm590_vm7 }
 0x504   : > { %v586_v9 = vsub.f32 1.0, %v585_v8 }
 0x506   : > { %v587_v11 = vmul.f32 %v918_v7, %v586_v9 }
 0x508   : > { %v588_v13 = vadd.f32 %v918_v7, %v587_v11 }
 0x50a   : > { %v592_v15 = vsel %vm591_vm9, %v918_v7, %v588_v13 }
 0x50b   : > { %v597_v16 = vsel %vm594_vm10, %v596_v14, %v592_v15 }
 0x50c   : > { %v598_v17 = vmul.f32 %v916_v3, %v597_v16 }
 0x50e   : > { %632 = vrot.lane.b32.xlu0 %v598_v17, %s1122_s3  ;;  %823 = vmatmul.msk.f32.vlgmr.msrb.gmra.mxu1 %vm600_vm11, %v598_v17 }
 0x580   : > { %v633_v19 = vpop.permute.xlu0 %632 }
 0x58b   : > { %v621_v18 = vpop.f32.mrf.mxu1 }
 0x58c   : > { %v635_v20 = vsel %vm415_vm1, %v621_v18, %v517_v55  ;;  %626 = vrot.lane.b32.xlu0 %v621_v18, %s1123_s18 }
 0x58d   : > { %v636_v21 = vsel %vm418_vm0, %v635_v20, %v633_v19 }
 0x58e   : > { %v638_v22 = vsel %vm637_vm12, %v636_v21, 0.0 }
 0x58f   : > { %639 = vst [vmem:[#allocation10] sm:$0x1] %v638_v22 }
 0x5fe   : > { %v627_v23 = vpop.permute.xlu0 %626 }
 0x5ff   : > { %v629_v24 = vsel %vm415_vm1, %v524_v59, %v627_v23 }
 0x600   : > { %631 = vst.msk [vmem:[#allocation2] sm:$0x1] %vm630_vm13, %v629_v24 }
 0x601 PF: > { %v648_v25 = vld [vmem:[%s1299_s23 + $0x38] sm:$0xff]  ;;  %v647_v26 = vld [vmem:[%s1299_s23 + $0x30] sm:$0xff]  ;;  %v646_v27 = vld [vmem:[%s1299_s23 + $0x28] sm:$0xff]  ;;  %vm650_vm14 = vcmask 523264   ;;  %s1125_s3 = smov [#allocation10]   ;;  %s700_s21 = sshll.u32 %s1434_s9, 4  ;;  %s701_s21 = int_to_ptr.hbm [resolvable:$true] %s700_s21 }
 0x602   : > { %662 = vmatpush.msra.mxu0 %v648_v25  ;;  %v645_v28 = vld [vmem:[%s1299_s23 + $0x20] sm:$0xff]  ;;  %v644_v29 = vld [vmem:[%s1299_s23 + $0x18] sm:$0xff]  ;;  %v643_v30 = vld [vmem:[%s1299_s23 + $0x10] sm:$0xff]  ;;  %s698_s30 = sshll.u32 %s1125_s3, 4  ;;  %p1460_p6 = scmp.eq.s32.totalorder %s1197_s13, 2  ;;  %s699_s30 = int_to_ptr.vmem [resolvable:$true] %s698_s30 }
 0x603   : > { %v642_v31 = vld [vmem:[%s1299_s23 + $0x8] sm:$0xff]  ;;  %v641_v32 = vld [vmem:[%s1299_s23] sm:$0xff]  ;;  %s1462_s17 = sld [smem:[#allocation24_spill]]  ;;  %v649_v34 = vld [vmem:[%s394_s19] sm:$0x1]  ;;  %s686_s25 = sshll.u32 %s389_s28, 4  ;;  %s687_s25 = int_to_ptr.vmem [resolvable:$true] %s686_s25 }
 0x604   : > { %663 = vmatpush.msra.mxu0 %v647_v26  ;;  %841 = dma.vmem_to_hbm [thread:$0]  (%p1460_p6), %s699_s30, 16, %s701_s21, [#allocation11]  }
 0x605   : > { %s676_s15 = scalar_lea.sflag [#allocation5], %s1296_s8 }
 0x606   : > { %664 = vmatpush.msra.mxu0 %v646_v27 }
 0x607   : > { %v640_v33 = vld [vmem:[#allocation2] sm:$0x1] }
 0x608   : > { %665 = vmatpush.msra.mxu0 %v645_v28 }
 0x609   : > { %s684_s24 = scalar_lea.hbm %s1462_s17, %s1197_s13  ;;  %s1057_s19 = scalar_lea.hbm %s1462_s17, 3 }
 0x60a   : > { %666 = vmatpush.msra.mxu0 %v644_v29  ;;  %s688_s26 = sshll.u32 %s684_s24, 4  ;;  %s689_s26 = int_to_ptr.hbm [resolvable:$true] %s688_s26 }
 0x60b   : > { %s1051_s22 = sshra.s32 %s689_s26, 4  ;;  %s1052_s22 = int_to_ptr.hbm [resolvable:$true] %s1051_s22 }
 0x60c   : > { %667 = vmatpush.msra.mxu0 %v643_v30  ;;  %s1053_s3 = scalar_lea.hbm %s1052_s22, 1  ;;  %p1058_p5 = scmp.lt.s32.totalorder %s1052_s22, %s1462_s17 }
 0x60d   : > { %p1054_p13 = scmp.ne.s32.totalorder %s1052_s22, %s1053_s3  ;;  %p1059_p9 = scmp.lt.s32.totalorder %s1057_s19, %s1053_s3 }
 0x60e   : > { %668 = vmatpush.msra.mxu0 %v642_v31 }
 0x60f   : > { %p1055_p1 = pnand %p1054_p13, %p1230_p11  ;;  %p1060_p10 = por %p1059_p9, %p1058_p5 }
 0x610   : > { %669 = vmatpush.msra.mxu0 %v641_v32 }
 0x611   : > { %824 = vmatmul.msk.f32.vlgmr.msra.gmra.mxu0 %vm650_vm14, %v640_v33  ;;  %p1056_p8 = pneg %p1055_p1 }
 0x613   : > { %p1061_p2 = pnand %p1060_p10, %p1056_p8 }
 0x68e   : > { %v671_v35 = vpop.f32.mrf.mxu0 }
 0x68f   : > { %v672_v36 = vadd.f32 %v671_v35, %v649_v34 }
 0x691   : > { %674 = vst [vmem:[%s389_s28] sm:$0x1] %v672_v36 }
 0x692   : > { %1064 = shalt.err (!%p1061_p2)
}
 0x693   : > { %839 = dma.vmem_to_hbm [thread:$0]  (%p1230_p11), %s687_s25, 16, %s689_s26, %s676_s15  }
 0x694   : > { %p1463_p0 = pmov %p1460_p6 }
 0x696   : > { %1094 = dma.done.wait (%p1463_p0), [#allocation11], 16   ;;  %p1464_p3 = pmov %p1463_p0 }
 0x698   : > { %1096 = vsyncadd (%p1464_p3), [#allocation11], 4294967280 }
 0x699 PF: > { %s1465_s8 = sld [smem:[#allocation17_spill]]  ;;  %p867_p4 = scmp.ge.s32.totalorder %s1115_s12, 2 }
 0x69b   : > { %p857_p7 = pnand %p867_p4, %p1234_p12 }
 0x69d   : > { %p858_p6 = pneg %p857_p7 }
 0x69f   : > { %s717_s21 = sand.u32 1, %s1465_s8  }
 0x6a0   : > { %s718_s16 = scalar_lea.sflag [#allocation5], %s717_s21 }
 0x6a1   : > { %1098 = dma.done.wait (%p858_p6), %s718_s16, 16  }
 0x6a2   : > { %1100 = vsyncadd (%p858_p6), %s718_s16, 4294967280  ;;  %s1467_s12 = sld [smem:[#allocation18_spill]]  ;;  %s1469_s30 = smov %s1107_s10 }
 0x6a3   : > { %s1468_s14 = sld [smem:[#allocation19_spill]]  ;;  %s1470_s10 = smov %s1111_s11 }
 0x6a8   : > { %p23_p11 = scmp.ge.s32.totalorder %s1467_s12, 5  }
 0x6a9   : > { %s1471_s11 = smov %s1468_s14 }
 0x6aa   :  { %25 = sbr.rel (!%p23_p11) target bundleno = 10 (0xa), region = 119 }
 0x6af   :  { %723 = vsyncpa [#allocation4], 1 }
 0x6b0   :  { %725 = vsyncpa [#allocation4 + $0x1], 1 }
 0x6b1   :  { %726 = vsyncpa [#allocation7], 1 }
 0x6b2   :  { %727 = vsyncpa [#allocation5], 1 }
 0x6b3   :  { %729 = vsyncpa [#allocation5 + $0x1], 1 }
 0x6b4   :  { %730 = vsyncpa [#allocation11], 1 }

</bundles_post_ra>
